<compile_context>
chip_gen: v7x
topology: tpu7x:2x2x1
jax: 0.10.0
libtpu: 0.0.40
codegen_flags: <defaults>
</compile_context>

<pallas_src>
import jax
import jax.numpy as jnp
from jax.experimental import pallas as pl
from jax.experimental.pallas import tpu as pltpu


def dqn_kernel(x_ref, w1_ref, b1_ref, w2_ref, b2_ref, w3_ref, b3_ref, o_ref):
    # Fused 3-layer MLP on one batch tile. bf16 MXU matmuls with f32 accumulation,
    # bias-add + ReLU in f32 on the VPU; everything stays resident in VMEM.
    x = x_ref[...].astype(jnp.bfloat16)                              # VPU cast (free)
    h1 = jnp.dot(x, w1_ref[...], preferred_element_type=jnp.float32) + b1_ref[...]
    h1 = jnp.maximum(h1, 0.0).astype(jnp.bfloat16)
    h2 = jnp.dot(h1, w2_ref[...], preferred_element_type=jnp.float32) + b2_ref[...]
    h2 = jnp.maximum(h2, 0.0).astype(jnp.bfloat16)
    y = jnp.dot(h2, w3_ref[...], preferred_element_type=jnp.float32) + b3_ref[...]
    o_ref[...] = y.astype(o_ref.dtype)                               # (tile, output_dim)


def _round_up(n, m):
    return ((n + m - 1) // m) * m


def _num_tensorcores():
    """v7x has 2 TensorCores per chip (megacore); v5e/v6e have 1."""
    try:
        kind = jax.devices()[0].device_kind.lower()
    except Exception:  # device query only; never wraps the pallas_call build
        return 1
    return 2 if "v7" in kind else 1


def _vmem_capacity_bytes():
    try:
        return int(pltpu.get_tpu_info().vmem_capacity_bytes)
    except Exception:
        return 64 << 20   # v7x-safe lower bound (v5e/v6e have 128 MiB)


def _lane_pad(d):
    return _round_up(d, 128)


def _working_set_bytes(batch_tile, input_dim, hidden, output_dim):
    """VMEM working set, accounting for 128-lane padding of narrow arrays."""
    per_row = (
        2 * _lane_pad(input_dim) * 4      # double-buffered f32 x tile
        + 2 * _lane_pad(output_dim) * 4   # double-buffered f32 out tile
        + 2 * _lane_pad(hidden) * 4       # h1/h2 f32 temporaries
        + _lane_pad(input_dim) * 2        # bf16 x
        + 2 * _lane_pad(hidden) * 2       # bf16 h1/h2
    )
    weights = 2 * 2 * (input_dim * _lane_pad(hidden)
                       + hidden * _lane_pad(hidden)
                       + hidden * _lane_pad(output_dim))              # bf16, dbl-buf
    biases = 2 * 4 * (2 * _lane_pad(hidden) + _lane_pad(output_dim))  # f32, dbl-buf
    return batch_tile * per_row + weights + biases


def _choose_tiling(B, input_dim, hidden, output_dim):
    """Pick (batch_tile, padded_B): one grid step on single-TC chips (v5e/v6e),
    two balanced steps on v7x, more only when the VMEM budget forces it."""
    capacity = _vmem_capacity_bytes()
    per_row = (_working_set_bytes(1, input_dim, hidden, output_dim)
               - _working_set_bytes(0, input_dim, hidden, output_dim))
    tile_budget = capacity // 4
    max_tile = max(8, min(8192, (tile_budget // per_row) // 8 * 8))

    num_tc = _num_tensorcores()
    ideal = _round_up(max(1, -(-B // num_tc)), 8)   # ceil(B / num_tc), multiple of 8
    batch_tile = min(ideal, max_tile)
    steps = -(-B // batch_tile)
    steps = _round_up(steps, num_tc)                # even step count on v7x
    batch_tile = _round_up(-(-B // steps), 8)       # rebalance -> minimal padding
    return batch_tile, steps * batch_tile


def _build_dqn_call(B_pad, batch_tile, input_dim, hidden, output_dim, vmem_limit_bytes):
    def const2d(shape):
        # Constant (0,0) index_map -> weights/biases stay resident across grid steps.
        return pl.BlockSpec(shape, lambda i: (0, 0))

    grid = (B_pad // batch_tile,)
    in_specs = [
        pl.BlockSpec((batch_tile, input_dim), lambda i: (i, 0)),   # x tile (pipelined)
        const2d((input_dim, hidden)),                              # w1
        const2d((1, hidden)),                                      # b1
        const2d((hidden, hidden)),                                 # w2
        const2d((1, hidden)),                                      # b2
        const2d((hidden, output_dim)),                             # w3
        const2d((1, output_dim)),                                  # b3
    ]
    return pl.pallas_call(
        dqn_kernel,
        out_shape=jax.ShapeDtypeStruct((B_pad, output_dim), jnp.float32),
        grid_spec=pltpu.PrefetchScalarGridSpec(
            num_scalar_prefetch=0,
            grid=grid,
            in_specs=in_specs,
            out_specs=pl.BlockSpec((batch_tile, output_dim), lambda i: (i, 0)),
        ),
        compiler_params=pltpu.CompilerParams(
            dimension_semantics=("parallel",),   # independent batch tiles -> megacore on v7x
            vmem_limit_bytes=vmem_limit_bytes,
        ),
    )


def dqn_forward(x, params, *, batch_tile=None):
    """x: (B, input_dim) f32. params: dict of w1,b1,w2,b2,w3,b3 with W as (in, out)."""
    B, input_dim = x.shape
    hidden = params["w1"].shape[1]
    output_dim = params["w3"].shape[1]

    if batch_tile is None:
        batch_tile, B_pad = _choose_tiling(B, input_dim, hidden, output_dim)
    else:
        assert batch_tile == B or batch_tile % 8 == 0
        B_pad = _round_up(B, batch_tile)

    capacity = _vmem_capacity_bytes()
    ws = _working_set_bytes(batch_tile, input_dim, hidden, output_dim)
    vmem_limit = int(min(max(2 * ws + (4 << 20), 16 << 20), 0.75 * capacity))

    x_f32 = x.astype(jnp.float32)
    if B_pad != B:
        x_f32 = jnp.pad(x_f32, ((0, B_pad - B), (0, 0)))

    # bf16 weights (tiny): native MXU path, f32 accumulation in-kernel.
    w1 = params["w1"].astype(jnp.bfloat16)
    w2 = params["w2"].astype(jnp.bfloat16)
    w3 = params["w3"].astype(jnp.bfloat16)
    b1 = params["b1"].reshape(1, hidden).astype(jnp.float32)
    b2 = params["b2"].reshape(1, hidden).astype(jnp.float32)
    b3 = params["b3"].reshape(1, output_dim).astype(jnp.float32)

    call = _build_dqn_call(B_pad, batch_tile, input_dim, hidden, output_dim, vmem_limit)
    out = call(x_f32, w1, b1, w2, b2, w3, b3)
    if B_pad != B:
        out = out[:B]
    return out


def init_dqn_params(key, input_dim, output_dim, hidden=64):
    """Deterministic init mimicking PyTorch nn.Linear (uniform(-1/sqrt(fan_in), +1/sqrt(fan_in))).
    Weights stored as (in, out) = transpose of PyTorch's (out, in)."""
    def linear(key, fan_in, fan_out):
        kw, kb = jax.random.split(key)
        bound = 1.0 / jnp.sqrt(fan_in)
        w = jax.random.uniform(kw, (fan_in, fan_out), jnp.float32, -bound, bound)
        b = jax.random.uniform(kb, (fan_out,), jnp.float32, -bound, bound)
        return w, b

    k1, k2, k3 = jax.random.split(key, 3)
    w1, b1 = linear(k1, input_dim, hidden)
    w2, b2 = linear(k2, hidden, hidden)
    w3, b3 = linear(k3, hidden, output_dim)
    return {"w1": w1, "b1": b1, "w2": w2, "b2": b2, "w3": w3, "b3": b3}


def dqn_reference(x, params, *, bf16_inputs=True):
    """Pure-JAX reference. With bf16_inputs=True it mirrors the kernel's bf16-input /
    f32-accumulate math so tolerances can stay tight."""
    dt = jnp.bfloat16 if bf16_inputs else jnp.float32
    w1 = params["w1"].astype(dt)
    w2 = params["w2"].astype(dt)
    w3 = params["w3"].astype(dt)
    h1 = jnp.dot(x.astype(dt), w1, preferred_element_type=jnp.float32) + params["b1"]
    h1 = jnp.maximum(h1, 0.0)
    h2 = jnp.dot(h1.astype(dt), w2, preferred_element_type=jnp.float32) + params["b2"]
    h2 = jnp.maximum(h2, 0.0)
    return jnp.dot(h2.astype(dt), w3, preferred_element_type=jnp.float32) + params["b3"]


if __name__ == "__main__":
    key = jax.random.PRNGKey(0)
    k_params, k_x = jax.random.split(key)

    # Small shapes consistent with the DQN module: batch=32, obs dim=8, 4 actions, hidden=64.
    batch, input_dim, output_dim = 32, 8, 4
    params = init_dqn_params(k_params, input_dim, output_dim, hidden=64)
    x = jax.random.normal(k_x, (batch, input_dim), jnp.float32)

    out = jax.block_until_ready(dqn_forward(x, params))

    ref = dqn_reference(x, params, bf16_inputs=True)
    assert out.shape == (batch, output_dim)
    max_err = float(jnp.max(jnp.abs(out - ref)))
    assert jnp.allclose(out, ref, atol=2e-2, rtol=2e-2), f"mismatch vs reference, max_err={max_err}"
    print("KERNEL_OK")
</pallas_src>

<mosaic_0001>
module attributes {stable_mosaic.version = 11 : i64} {
  func.func @dqn_kernel(%arg0: i32, %arg1: memref<32x8xf32, #tpu.memory_space<vmem>>, %arg2: memref<8x64xbf16, #tpu.memory_space<vmem>>, %arg3: memref<1x64xf32, #tpu.memory_space<vmem>>, %arg4: memref<64x64xbf16, #tpu.memory_space<vmem>>, %arg5: memref<1x64xf32, #tpu.memory_space<vmem>>, %arg6: memref<64x4xbf16, #tpu.memory_space<vmem>>, %arg7: memref<1x4xf32, #tpu.memory_space<vmem>>, %arg8: memref<32x4xf32, #tpu.memory_space<vmem>>) attributes {dimension_semantics = [#tpu.dimension_semantics<parallel>], iteration_bounds = array<i64: 1>, scalar_prefetch = 0 : i64, scratch_operands = 0 : i64, tpu.core_type = #tpu.core_type<tc>, window_params = [{transform_indices = @transform_0, window_bounds = array<i64: 32, 8>}, {pipeline_mode = #tpu.pipeline_mode<synchronous>, transform_indices = @transform_1, window_bounds = array<i64: 8, 64>}, {pipeline_mode = #tpu.pipeline_mode<synchronous>, transform_indices = @transform_2, window_bounds = array<i64: 1, 64>}, {pipeline_mode = #tpu.pipeline_mode<synchronous>, transform_indices = @transform_3, window_bounds = array<i64: 64, 64>}, {pipeline_mode = #tpu.pipeline_mode<synchronous>, transform_indices = @transform_4, window_bounds = array<i64: 1, 64>}, {pipeline_mode = #tpu.pipeline_mode<synchronous>, transform_indices = @transform_5, window_bounds = array<i64: 64, 4>}, {pipeline_mode = #tpu.pipeline_mode<synchronous>, transform_indices = @transform_6, window_bounds = array<i64: 1, 4>}, {transform_indices = @transform_7, window_bounds = array<i64: 32, 4>}]} {
    %c0 = arith.constant 0 : index
    %c0_0 = arith.constant 0 : index
    %0 = vector.load %arg1[%c0, %c0_0] : memref<32x8xf32, #tpu.memory_space<vmem>>, vector<32x8xf32>
    %1 = arith.truncf %0 : vector<32x8xf32> to vector<32x8xbf16>
    %c0_1 = arith.constant 0 : index
    %c0_2 = arith.constant 0 : index
    %2 = vector.load %arg2[%c0_1, %c0_2] : memref<8x64xbf16, #tpu.memory_space<vmem>>, vector<8x64xbf16>
    %cst = arith.constant dense<0.000000e+00> : vector<32x64xf32>
    %3 = tpu.matmul %1, %2, %cst {dimension_numbers = #tpu.dot_dimension_numbers<[1], [0], [0], [1], [0, 0, 1, 1], [], []>} : vector<32x8xbf16>, vector<8x64xbf16>, vector<32x64xf32> -> vector<32x64xf32>
    %c0_3 = arith.constant 0 : index
    %c0_4 = arith.constant 0 : index
    %4 = vector.load %arg3[%c0_3, %c0_4] : memref<1x64xf32, #tpu.memory_space<vmem>>, vector<1x64xf32>
    %5 = vector.broadcast %4 : vector<1x64xf32> to vector<32x64xf32>
    %6 = arith.addf %3, %5 : vector<32x64xf32>
    %cst_5 = arith.constant 0.000000e+00 : f32
    %7 = vector.broadcast %cst_5 : f32 to vector<32x64xf32>
    %8 = arith.maximumf %6, %7 : vector<32x64xf32>
    %9 = arith.truncf %8 : vector<32x64xf32> to vector<32x64xbf16>
    %c0_6 = arith.constant 0 : index
    %c0_7 = arith.constant 0 : index
    %10 = vector.load %arg4[%c0_6, %c0_7] : memref<64x64xbf16, #tpu.memory_space<vmem>>, vector<64x64xbf16>
    %cst_8 = arith.constant dense<0.000000e+00> : vector<32x64xf32>
    %11 = tpu.matmul %9, %10, %cst_8 {dimension_numbers = #tpu.dot_dimension_numbers<[1], [0], [0], [1], [0, 0, 1, 1], [], []>} : vector<32x64xbf16>, vector<64x64xbf16>, vector<32x64xf32> -> vector<32x64xf32>
    %c0_9 = arith.constant 0 : index
    %c0_10 = arith.constant 0 : index
    %12 = vector.load %arg5[%c0_9, %c0_10] : memref<1x64xf32, #tpu.memory_space<vmem>>, vector<1x64xf32>
    %13 = vector.broadcast %12 : vector<1x64xf32> to vector<32x64xf32>
    %14 = arith.addf %11, %13 : vector<32x64xf32>
    %cst_11 = arith.constant 0.000000e+00 : f32
    %15 = vector.broadcast %cst_11 : f32 to vector<32x64xf32>
    %16 = arith.maximumf %14, %15 : vector<32x64xf32>
    %17 = arith.truncf %16 : vector<32x64xf32> to vector<32x64xbf16>
    %c0_12 = arith.constant 0 : index
    %c0_13 = arith.constant 0 : index
    %18 = vector.load %arg6[%c0_12, %c0_13] : memref<64x4xbf16, #tpu.memory_space<vmem>>, vector<64x4xbf16>
    %cst_14 = arith.constant dense<0.000000e+00> : vector<32x4xf32>
    %19 = tpu.matmul %17, %18, %cst_14 {dimension_numbers = #tpu.dot_dimension_numbers<[1], [0], [0], [1], [0, 0, 1, 1], [], []>} : vector<32x64xbf16>, vector<64x4xbf16>, vector<32x4xf32> -> vector<32x4xf32>
    %c0_15 = arith.constant 0 : index
    %c0_16 = arith.constant 0 : index
    %20 = vector.load %arg7[%c0_15, %c0_16] : memref<1x4xf32, #tpu.memory_space<vmem>>, vector<1x4xf32>
    %21 = vector.broadcast %20 : vector<1x4xf32> to vector<32x4xf32>
    %22 = arith.addf %19, %21 : vector<32x4xf32>
    %c0_17 = arith.constant 0 : index
    %c0_18 = arith.constant 0 : index
    %23 = vector.load %arg8[%c0_17, %c0_18] : memref<32x4xf32, #tpu.memory_space<vmem>>, vector<32x4xf32>
    tpu.vector_store %arg8[%c0_17, %c0_18], %22 {strides = array<i32>} : memref<32x4xf32, #tpu.memory_space<vmem>>, vector<32x4xf32>,
    return
  }
  func.func @transform_0(%arg0: i32) -> (i32, i32) {
    %c0_i32 = arith.constant 0 : i32
    %c0_i32_0 = arith.constant 0 : i32
    return %arg0, %c0_i32 : i32, i32
  }
  func.func @transform_1(%arg0: i32) -> (i32, i32) {
    %c0_i32 = arith.constant 0 : i32
    %c0_i32_0 = arith.constant 0 : i32
    %c0_i32_1 = arith.constant 0 : i32
    return %c0_i32, %c0_i32_0 : i32, i32
  }
  func.func @transform_2(%arg0: i32) -> (i32, i32) {
    %c0_i32 = arith.constant 0 : i32
    %c0_i32_0 = arith.constant 0 : i32
    %c0_i32_1 = arith.constant 0 : i32
    return %c0_i32, %c0_i32_0 : i32, i32
  }
  func.func @transform_3(%arg0: i32) -> (i32, i32) {
    %c0_i32 = arith.constant 0 : i32
    %c0_i32_0 = arith.constant 0 : i32
    %c0_i32_1 = arith.constant 0 : i32
    return %c0_i32, %c0_i32_0 : i32, i32
  }
  func.func @transform_4(%arg0: i32) -> (i32, i32) {
    %c0_i32 = arith.constant 0 : i32
    %c0_i32_0 = arith.constant 0 : i32
    %c0_i32_1 = arith.constant 0 : i32
    return %c0_i32, %c0_i32_0 : i32, i32
  }
  func.func @transform_5(%arg0: i32) -> (i32, i32) {
    %c0_i32 = arith.constant 0 : i32
    %c0_i32_0 = arith.constant 0 : i32
    %c0_i32_1 = arith.constant 0 : i32
    return %c0_i32, %c0_i32_0 : i32, i32
  }
  func.func @transform_6(%arg0: i32) -> (i32, i32) {
    %c0_i32 = arith.constant 0 : i32
    %c0_i32_0 = arith.constant 0 : i32
    %c0_i32_1 = arith.constant 0 : i32
    return %c0_i32, %c0_i32_0 : i32, i32
  }
  func.func @transform_7(%arg0: i32) -> (i32, i32) {
    %c0_i32 = arith.constant 0 : i32
    %c0_i32_0 = arith.constant 0 : i32
    return %arg0, %c0_i32 : i32, i32
  }
}

</mosaic_0001>

<bundles_post_ra>
// kernel: tpu_custom_call.1
= control target key start
LH: loop header
LB: loop body
LE: loop exit
PB: predicated region body
PF: predicated region fallthrough
CT: control target
= control target key end

     0   :  { %vm48_vm0 = vcmask 1043456   ;;  %vm41_vm1 = vcmask 64512   ;;  %vm146_vm2 = vcmask 523264   ;;  %vm302_vm3 = vcmask 31744   ;;  %s486_s1 = inlined_call_operand.vmem [shape: bf16[8,64], index: 1, kind: input, shape index: {}]   ;;  %s487_s0 = inlined_call_operand.vmem [shape: f32[32,8], index: 0, kind: input, shape index: {}]   ;;  %s488_s3 = inlined_call_operand.vmem [shape: bf16[64,64], index: 3, kind: input, shape index: {}]   ;;  %s489_s5 = inlined_call_operand.vmem [shape: bf16[64,4], index: 5, kind: input, shape index: {}]   ;;  %s490_s2 = inlined_call_operand.vmem [shape: f32[1,64], index: 2, kind: input, shape index: {}]   ;;  %s491_s4 = inlined_call_operand.vmem [shape: f32[1,64], index: 4, kind: input, shape index: {}]   ;;  %s492_s6 = inlined_call_operand.vmem [shape: f32[1,4], index: 6, kind: input, shape index: {}]   ;;  %s493_s7 = inlined_call_operand.vmem [shape: f32[32,4], index: 7, kind: output, shape index: {}]  }
   0x1   :  { %v33_v0 = vld [vmem:[%s486_s1] sm:$0xf]  ;;  %v28_v2 = vld [vmem:[%s487_s0 + $0x8] sm:$0xff]  ;;  %v29_v5 = vld [vmem:[%s487_s0 + $0x10] sm:$0xff] }
   0x2   :  { %v27_v1 = vld [vmem:[%s487_s0] sm:$0xff]  ;;  %373 = vmatprep.subr.msk.bf16.mxu0 %vm48_vm0, %v33_v0  ;;  %v50_v3 = vsel %vm48_vm0, %v33_v0, 0  ;;  %v30_v6 = vld [vmem:[%s487_s0 + $0x18] sm:$0xff]  ;;  %v375_v9 = vld [vmem:[%s488_s3 + $0x8] sm:$0xff]  }
   0x3   :  { %v31_v4 = vpack.c.bf16 %v28_v2, %v27_v1  ;;  %344 = vmatpush3.bf16.msra.mxu0 %v50_v3  ;;  %v32_v7 = vpack.c.bf16 %v30_v6, %v29_v5  ;;  %v374_v8 = vld [vmem:[%s488_s3] sm:$0xff]   ;;  %v376_v10 = vld [vmem:[%s488_s3 + $0x10] sm:$0xff]   ;;  %v377_v11 = vld [vmem:[%s488_s3 + $0x18] sm:$0xff]  }
   0x4   :  { %349 = vmatprep.subr.bf16.mxu1 %v374_v8  ;;  %v378_v12 = vld [vmem:[%s489_s5] sm:$0xff]   ;;  %v379_v13 = vld [vmem:[%s489_s5 + $0x8] sm:$0xff]   ;;  %v380_v29 = vld [vmem:[%s489_s5 + $0x10] sm:$0xff]  }
   0x5   :  { %345 = vmatprep.mubr.msk.bf16.mxu0 %vm41_vm1, %v31_v4  ;;  %350 = vmatpush3.bf16.msra.mxu1 %v374_v8  ;;  %v311_v14 = vld [vmem:[%s490_s2] ss:$0 sm:$0xff]  ;;  %v381_v30 = vld [vmem:[%s489_s5 + $0x18] sm:$0xff]  }
   0x6   :  { %346 = vmatmul.mubr.msk.bf16.vlgmr.msra.gmra.mrb[0].mxu0 %vm41_vm1, %v32_v7  ;;  %351 = vmatprep.subr.bf16.mxu1 %v375_v9  ;;  %v314_v31 = vld [vmem:[%s491_s4] ss:$0 sm:$0xff] }
   0x7   :  { %361 = vmatprep.subr.bf16.mxu0 %v378_v12  ;;  %v321_v46 = vld [vmem:[%s492_s6] ss:$0 sm:$0xff] }
   0x8   :  { %362 = vmatpush3.bf16.msra.mxu0 %v378_v12 }
   0x9   :  { %352 = vmatpush3.bf16.msra.mxu1 %v375_v9  ;;  %363 = vmatprep.subr.bf16.mxu0 %v379_v13 }
   0xa   :  { %353 = vmatprep.subr.bf16.mxu1 %v376_v10 }
   0xc   :  { %364 = vmatpush3.bf16.msra.mxu0 %v379_v13 }
   0xd   :  { %354 = vmatpush3.bf16.msra.mxu1 %v376_v10  ;;  %365 = vmatprep.subr.bf16.mxu0 %v380_v29 }
   0xe   :  { %355 = vmatprep.subr.bf16.mxu1 %v377_v11 }
  0x10   :  { %366 = vmatpush3.bf16.msra.mxu0 %v380_v29 }
  0x11   :  { %356 = vmatpush3.bf16.msra.mxu1 %v377_v11  ;;  %367 = vmatprep.subr.bf16.mxu0 %v381_v30 }
  0x14   :  { %368 = vmatpush3.bf16.msra.mxu0 %v381_v30 }
  0xd9   :  { %v347_v15 = vpop.f32.mrb[0].mxu0 }
  0xda   :  { %v95_v16 = vadd.f32 %v347_v15, %v311_v14  ;;  %v86_v17 = vpop.f32.mrb[1].mxu0 }
  0xdb   :  { %v87_v18 = vadd.f32 %v311_v14, %v86_v17  ;;  %v348_v19 = vpop.f32.mrb[2].mxu0 }
  0xdc   :  { %v98_v20 = vadd.f32 %v348_v19, %v311_v14  ;;  %v89_v21 = vpop.f32.mrb[3].mxu0  ;;  %v103_v23 = vmax.f32 %v95_v16, 0.0 }
  0xdd   :  { %v90_v22 = vadd.f32 %v311_v14, %v89_v21  ;;  %v101_v25 = vmax.f32 %v87_v18, 0.0 }
  0xde   :  { %v104_v24 = vmax.f32 %v98_v20, 0.0 }
  0xdf   :  { %v102_v26 = vmax.f32 %v90_v22, 0.0 }
  0xe0   :  { %v106_v27 = vpack.c.bf16 %v104_v24, %v103_v23 }
  0xe1   :  { %v105_v28 = vpack.c.bf16 %v102_v26, %v101_v25 }
  0xe3   :  { %357 = vmatprep.mubr.msk.bf16.mxu1 %vm146_vm2, %v105_v28 }
  0xe4   :  { %358 = vmatmul.mubr.msk.bf16.vlgmr.msra.gmra.mrb[0].mxu1 %vm146_vm2, %v106_v27 }
 0x1b7   :  { %v359_v32 = vpop.f32.mrb[0].mxu1 }
 0x1b8   :  { %v196_v33 = vadd.f32 %v359_v32, %v314_v31  ;;  %v187_v34 = vpop.f32.mrb[1].mxu1 }
 0x1b9   :  { %v188_v35 = vadd.f32 %v314_v31, %v187_v34  ;;  %v360_v36 = vpop.f32.mrb[2].mxu1 }
 0x1ba   :  { %v199_v37 = vadd.f32 %v360_v36, %v314_v31  ;;  %v190_v38 = vpop.f32.mrb[3].mxu1  ;;  %v204_v40 = vmax.f32 %v196_v33, 0.0 }
 0x1bb   :  { %v191_v39 = vadd.f32 %v314_v31, %v190_v38  ;;  %v202_v42 = vmax.f32 %v188_v35, 0.0 }
 0x1bc   :  { %v205_v41 = vmax.f32 %v199_v37, 0.0 }
 0x1bd   :  { %v203_v43 = vmax.f32 %v191_v39, 0.0 }
 0x1be   :  { %v207_v44 = vpack.c.bf16 %v205_v41, %v204_v40 }
 0x1bf   :  { %v206_v45 = vpack.c.bf16 %v203_v43, %v202_v42 }
 0x1c1   :  { %369 = vmatprep.mubr.msk.bf16.mxu0 %vm146_vm2, %v206_v45 }
 0x1c2   :  { %370 = vmatmul.mubr.msk.bf16.vlgmr.msra.gmra.mrb[4].mxu0 %vm146_vm2, %v207_v44 }
 0x295   :  { %v371_v47 = vpop.f32.mrb[4].mxu0 }
 0x296   :  { %v296_v48 = vadd.f32 %v371_v47, %v321_v46  ;;  %v287_v49 = vpop.f32.mrb[5].mxu0 }
 0x297   :  { %v288_v50 = vadd.f32 %v321_v46, %v287_v49  ;;  %v372_v51 = vpop.f32.mrb[6].mxu0 }
 0x298   :  { %305 = vst.msk [vmem:[%s493_s7 + $0x10] sm:$0xff] %vm302_vm3, %v296_v48  ;;  %v299_v52 = vadd.f32 %v372_v51, %v321_v46  ;;  %v290_v53 = vpop.f32.mrb[7].mxu0 }
 0x299   :  { %303 = vst.msk [vmem:[%s493_s7] sm:$0xff] %vm302_vm3, %v288_v50  ;;  %v291_v54 = vadd.f32 %v321_v46, %v290_v53 }
 0x29a   :  { %306 = vst.msk [vmem:[%s493_s7 + $0x18] sm:$0xff] %vm302_vm3, %v299_v52 }
 0x29b   :  { %304 = vst.msk [vmem:[%s493_s7 + $0x8] sm:$0xff] %vm302_vm3, %v291_v54 }

</bundles_post_ra>
